<compile_context>
chip_gen: v7x
topology: tpu7x:2x2x1
jax: 0.10.0
libtpu: 0.0.40
codegen_flags: <defaults>
</compile_context>

<pallas_src>
import jax
import jax.numpy as jnp
from jax.experimental import pallas as pl
from jax.experimental.pallas import tpu as pltpu


def _cdiv(a, b):
    return -(-a // b)


def _round_up(a, m):
    return _cdiv(a, m) * m


def _tensorcores_per_chip():
    """2 on v7x-class chips (megacore sharding target), else 1."""
    try:
        kind = jax.devices()[0].device_kind.lower()
    except Exception:
        return 1
    return 2 if ("v7" in kind or "7x" in kind) else 1


def mlp_kernel(x_ref, w1_ref, b1_ref, w2_ref, b2_ref, w3_ref, b3_ref, o_ref):
    """One (tm, D) batch tile; all three layers stay in VMEM/vregs.

    x_ref  : (tm, D)   f32        batch tile (cast to MXU dtype in-kernel)
    w1_ref : (H1, D)   bf16/f32   PyTorch (out, in) orientation
    b1_ref : (H1, 1)   f32
    w2_ref : (H2, H1)  bf16/f32
    b2_ref : (H2, 1)   f32
    w3_ref : (H2, 1)   f32
    b3_ref : (1,)      f32        scalar in SMEM
    o_ref  : (1, tm)   f32        lane-dense sigmoid output row
    """
    # Transpose the tile (XLU, hides under MXU work) then cast on the VPU, so
    # the wrapper never makes an extra HBM pass over x.
    xT = jnp.transpose(x_ref[...]).astype(w1_ref.dtype)            # (D, tm)
    # Layer 1: (H1, D) @ (D, tm) on the MXU, f32 accumulate, bias + ReLU.
    h = jnp.dot(w1_ref[...], xT, preferred_element_type=jnp.float32)
    h = jnp.maximum(h + b1_ref[...], 0.0)                          # (H1, tm)
    # Layer 2: (H2, H1) @ (H1, tm); N = tm keeps the MXU columns full.
    h = jnp.dot(w2_ref[...], h.astype(w2_ref.dtype),
                preferred_element_type=jnp.float32)
    h = jnp.maximum(h + b2_ref[...], 0.0)                          # (H2, tm)
    # Output head (out_dim == 1): VPU multiply + sublane reduction -> (1, tm),
    # already lane-dense, so the sigmoid epilogue and the store are dense.
    z = jnp.sum(h * w3_ref[...], axis=0, keepdims=True) + b3_ref[0]
    # Exact sigmoid; exp(-z) -> inf for very negative z yields exactly 0.
    o_ref[...] = 1.0 / (1.0 + jnp.exp(-z))


def click_mlp_forward(x, params, *, tm=4096, use_bf16=True):
    """x: (B, input_dim) f32.  Returns (B,) f32 — matches torch .squeeze(-1).

    tm = rows per grid step.  Weights (<200 KB) are resident, so VMEM use is
    dominated by the x tile and f32 intermediates (~12-18 MiB at tm=4096,
    within the raised 48 MiB scoped-VMEM limit on every TPU generation).
    """
    w1, b1, w2, b2, w3, b3 = params
    B, D = x.shape
    H1, H2 = w1.shape[0], w2.shape[0]

    # ---- tile-size selection (static Python ints) ----
    tm = max(8, min(_round_up(int(tm), 8), _round_up(B, 8)))
    n_tc = _tensorcores_per_chip()
    if n_tc > 1 and B >= 2 * n_tc * 128:
        # v7x: keep >=2 blocks per TensorCore so the 'parallel' axis really
        # shards across both cores.  Skipped on single-TC v5e/v6e.
        tm = min(tm, _round_up(_cdiv(B, 2 * n_tc), 128))
    if tm < _round_up(B, 8):
        # Multi-block grid: lane-dense (1, tm) output blocks need tm % 128 == 0.
        tm = _round_up(tm, 128)
    num_blocks = _cdiv(B, tm)

    # ---- operand preparation (tiny weight-side ops only; x goes in as-is) ----
    mm_dtype = jnp.bfloat16 if use_bf16 else jnp.float32
    w1k = w1.astype(mm_dtype)                           # (H1, D)
    w2k = w2.astype(mm_dtype)                           # (H2, H1)
    b1k = b1.reshape(H1, 1).astype(jnp.float32)
    b2k = b2.reshape(H2, 1).astype(jnp.float32)
    w3k = w3.reshape(H2, 1).astype(jnp.float32)         # column for the VPU head
    b3k = b3.reshape(1).astype(jnp.float32)             # scalar -> SMEM

    itemsize = 2 if use_bf16 else 4
    cost = pl.CostEstimate(
        flops=2 * B * (D * H1 + H1 * H2 + H2),
        transcendentals=B,                               # one exp per row
        bytes_accessed=B * D * 4 + (H1 * D + H2 * H1) * itemsize
        + (H1 + H2 + H2 + 1) * 4 + num_blocks * tm * 4,
    )

    out = pl.pallas_call(
        mlp_kernel,
        out_shape=jax.ShapeDtypeStruct((1, num_blocks * tm), jnp.float32),
        grid=(num_blocks,),
        in_specs=[
            pl.BlockSpec((tm, D), lambda i: (i, 0)),       # x tile over batch
            pl.BlockSpec((H1, D), lambda i: (0, 0)),       # W1 (resident)
            pl.BlockSpec((H1, 1), lambda i: (0, 0)),       # b1 column
            pl.BlockSpec((H2, H1), lambda i: (0, 0)),      # W2 (resident)
            pl.BlockSpec((H2, 1), lambda i: (0, 0)),       # b2 column
            pl.BlockSpec((H2, 1), lambda i: (0, 0)),       # W3 column
            pl.BlockSpec(memory_space=pltpu.MemorySpace.SMEM),  # b3 scalar
        ],
        out_specs=pl.BlockSpec((1, tm), lambda i: (0, i)),
        compiler_params=pltpu.CompilerParams(
            dimension_semantics=("parallel",),
            vmem_limit_bytes=48 * 1024 * 1024),
        cost_estimate=cost,
    )(x, w1k, b1k, w2k, b2k, w3k, b3k)
    return out[0, :B]                                      # squeeze(-1)


def init_click_mlp_params(key, input_dim, hidden_dims=(256, 128)):
    """nn.Linear-style init; weights stored PyTorch-style as (out_dim, in_dim)."""
    dims = [input_dim] + list(hidden_dims) + [1]
    params = []
    for in_dim, out_dim in zip(dims[:-1], dims[1:]):
        key, kw, kb = jax.random.split(key, 3)
        bound = 1.0 / float(in_dim) ** 0.5
        w = jax.random.uniform(kw, (out_dim, in_dim), jnp.float32, -bound, bound)
        b = jax.random.uniform(kb, (out_dim,), jnp.float32, -bound, bound)
        params += [w, b]
    return tuple(params)


def click_mlp_reference(x, params):
    """Pure-JAX f32 reference of the same forward pass."""
    w1, b1, w2, b2, w3, b3 = params
    h = jnp.maximum(x @ w1.T + b1, 0.0)
    h = jnp.maximum(h @ w2.T + b2, 0.0)
    return jax.nn.sigmoid(h @ w3.T + b3)[:, 0]


if __name__ == "__main__":
    key = jax.random.PRNGKey(0)
    key_x, key_p, key_x2 = jax.random.split(key, 3)

    input_dim = 32
    params = init_click_mlp_params(key_p, input_dim, hidden_dims=(256, 128))

    # Small shape matching the module spec: bf16 MXU path, single block.
    x_small = jax.random.normal(key_x, (8, input_dim), jnp.float32)
    y = jax.block_until_ready(click_mlp_forward(x_small, params))
    y_ref = click_mlp_reference(x_small, params)
    assert y.shape == (8,), y.shape
    assert jnp.allclose(y, y_ref, atol=1e-2, rtol=1e-2), (y, y_ref)

    # Multi-block grid + ragged (masked) last block, f32 matmuls.
    x_big = jax.random.normal(key_x2, (200, input_dim), jnp.float32)
    y2 = jax.block_until_ready(
        click_mlp_forward(x_big, params, tm=128, use_bf16=False))
    y2_ref = click_mlp_reference(x_big, params)
    assert y2.shape == (200,), y2.shape
    assert jnp.allclose(y2, y2_ref, atol=5e-3, rtol=5e-3), (
        float(jnp.max(jnp.abs(y2 - y2_ref))))

    print("KERNEL_OK")
</pallas_src>

<mosaic_0001>
module attributes {stable_mosaic.version = 11 : i64} {
  func.func @mlp_kernel(%arg0: i32, %arg1: memref<8x32xf32, #tpu.memory_space<vmem>>, %arg2: memref<256x32xbf16, #tpu.memory_space<vmem>>, %arg3: memref<256x1xf32, #tpu.memory_space<vmem>>, %arg4: memref<128x256xbf16, #tpu.memory_space<vmem>>, %arg5: memref<128x1xf32, #tpu.memory_space<vmem>>, %arg6: memref<128x1xf32, #tpu.memory_space<vmem>>, %arg7: memref<1xf32, #tpu.memory_space<smem>>, %arg8: memref<1x8xf32, #tpu.memory_space<vmem>>) attributes {dimension_semantics = [#tpu.dimension_semantics<parallel>], iteration_bounds = array<i64: 1>, scalar_prefetch = 0 : i64, scratch_operands = 0 : i64, tpu.core_type = #tpu.core_type<tc>, window_params = [{transform_indices = @transform_0, window_bounds = array<i64: 8, 32>}, {pipeline_mode = #tpu.pipeline_mode<synchronous>, transform_indices = @transform_1, window_bounds = array<i64: 256, 32>}, {pipeline_mode = #tpu.pipeline_mode<synchronous>, transform_indices = @transform_2, window_bounds = array<i64: 256, 1>}, {pipeline_mode = #tpu.pipeline_mode<synchronous>, transform_indices = @transform_3, window_bounds = array<i64: 128, 256>}, {pipeline_mode = #tpu.pipeline_mode<synchronous>, transform_indices = @transform_4, window_bounds = array<i64: 128, 1>}, {pipeline_mode = #tpu.pipeline_mode<synchronous>, transform_indices = @transform_5, window_bounds = array<i64: 128, 1>}, {transform_indices = @transform_6, window_bounds = array<i64: 1>}, {transform_indices = @transform_7, window_bounds = array<i64: 1, 8>}]} {
    %c0 = arith.constant 0 : index
    %c0_0 = arith.constant 0 : index
    %0 = vector.load %arg1[%c0, %c0_0] : memref<8x32xf32, #tpu.memory_space<vmem>>, vector<8x32xf32>
    %1 = tpu.transpose %0, [1, 0] : vector<8x32xf32> -> vector<32x8xf32>
    %2 = arith.truncf %1 : vector<32x8xf32> to vector<32x8xbf16>
    %c0_1 = arith.constant 0 : index
    %c0_2 = arith.constant 0 : index
    %3 = vector.load %arg2[%c0_1, %c0_2] : memref<256x32xbf16, #tpu.memory_space<vmem>>, vector<256x32xbf16>
    %cst = arith.constant dense<0.000000e+00> : vector<256x8xf32>
    %4 = tpu.matmul %3, %2, %cst {dimension_numbers = #tpu.dot_dimension_numbers<[1], [0], [0], [1], [0, 0, 1, 1], [], []>} : vector<256x32xbf16>, vector<32x8xbf16>, vector<256x8xf32> -> vector<256x8xf32>
    %c0_3 = arith.constant 0 : index
    %c0_4 = arith.constant 0 : index
    %5 = vector.load %arg3[%c0_3, %c0_4] : memref<256x1xf32, #tpu.memory_space<vmem>>, vector<256x1xf32>
    %6 = vector.broadcast %5 : vector<256x1xf32> to vector<256x8xf32>
    %7 = arith.addf %4, %6 : vector<256x8xf32>
    %cst_5 = arith.constant 0.000000e+00 : f32
    %8 = vector.broadcast %cst_5 : f32 to vector<256x8xf32>
    %9 = arith.maximumf %7, %8 : vector<256x8xf32>
    %c0_6 = arith.constant 0 : index
    %c0_7 = arith.constant 0 : index
    %10 = vector.load %arg4[%c0_6, %c0_7] : memref<128x256xbf16, #tpu.memory_space<vmem>>, vector<128x256xbf16>
    %11 = arith.truncf %9 : vector<256x8xf32> to vector<256x8xbf16>
    %cst_8 = arith.constant dense<0.000000e+00> : vector<128x8xf32>
    %12 = tpu.matmul %10, %11, %cst_8 {dimension_numbers = #tpu.dot_dimension_numbers<[1], [0], [0], [1], [0, 0, 1, 1], [], []>} : vector<128x256xbf16>, vector<256x8xbf16>, vector<128x8xf32> -> vector<128x8xf32>
    %c0_9 = arith.constant 0 : index
    %c0_10 = arith.constant 0 : index
    %13 = vector.load %arg5[%c0_9, %c0_10] : memref<128x1xf32, #tpu.memory_space<vmem>>, vector<128x1xf32>
    %14 = vector.broadcast %13 : vector<128x1xf32> to vector<128x8xf32>
    %15 = arith.addf %12, %14 : vector<128x8xf32>
    %cst_11 = arith.constant 0.000000e+00 : f32
    %16 = vector.broadcast %cst_11 : f32 to vector<128x8xf32>
    %17 = arith.maximumf %15, %16 : vector<128x8xf32>
    %c0_12 = arith.constant 0 : index
    %c0_13 = arith.constant 0 : index
    %18 = vector.load %arg6[%c0_12, %c0_13] : memref<128x1xf32, #tpu.memory_space<vmem>>, vector<128x1xf32>
    %19 = vector.broadcast %18 : vector<128x1xf32> to vector<128x8xf32>
    %20 = arith.mulf %17, %19 : vector<128x8xf32>
    %cst_14 = arith.constant dense<0.000000e+00> : vector<8xf32>
    %21 = vector.multi_reduction <add>, %20, %cst_14 [0] : vector<128x8xf32> to vector<8xf32>
    %22 = vector.shape_cast %21 : vector<8xf32> to vector<1x8xf32>
    %c0_15 = arith.constant 0 : index
    %23 = memref.load %arg7[%c0_15] : memref<1xf32, #tpu.memory_space<smem>>
    %24 = vector.broadcast %23 : f32 to vector<1x8xf32>
    %25 = arith.addf %22, %24 : vector<1x8xf32>
    %cst_16 = arith.constant 0.000000e+00 : f32
    %26 = vector.broadcast %cst_16 : f32 to vector<1x8xf32>
    %27 = arith.subf %26, %25 : vector<1x8xf32>
    %28 = math.exp %27 : vector<1x8xf32>
    %cst_17 = arith.constant 1.000000e+00 : f32
    %29 = vector.broadcast %cst_17 : f32 to vector<1x8xf32>
    %30 = arith.addf %29, %28 : vector<1x8xf32>
    %cst_18 = arith.constant 1.000000e+00 : f32
    %31 = vector.broadcast %cst_18 : f32 to vector<1x8xf32>
    %32 = arith.divf %31, %30 : vector<1x8xf32>
    %c0_19 = arith.constant 0 : index
    %c0_20 = arith.constant 0 : index
    %33 = vector.load %arg8[%c0_19, %c0_20] : memref<1x8xf32, #tpu.memory_space<vmem>>, vector<1x8xf32>
    tpu.vector_store %arg8[%c0_19, %c0_20], %32 {strides = array<i32>} : memref<1x8xf32, #tpu.memory_space<vmem>>, vector<1x8xf32>,
    return
  }
  func.func @transform_0(%arg0: i32) -> (i32, i32) {
    %c0_i32 = arith.constant 0 : i32
    %c0_i32_0 = arith.constant 0 : i32
    return %arg0, %c0_i32 : i32, i32
  }
  func.func @transform_1(%arg0: i32) -> (i32, i32) {
    %c0_i32 = arith.constant 0 : i32
    %c0_i32_0 = arith.constant 0 : i32
    %c0_i32_1 = arith.constant 0 : i32
    return %c0_i32, %c0_i32_0 : i32, i32
  }
  func.func @transform_2(%arg0: i32) -> (i32, i32) {
    %c0_i32 = arith.constant 0 : i32
    %c0_i32_0 = arith.constant 0 : i32
    %c0_i32_1 = arith.constant 0 : i32
    return %c0_i32, %c0_i32_0 : i32, i32
  }
  func.func @transform_3(%arg0: i32) -> (i32, i32) {
    %c0_i32 = arith.constant 0 : i32
    %c0_i32_0 = arith.constant 0 : i32
    %c0_i32_1 = arith.constant 0 : i32
    return %c0_i32, %c0_i32_0 : i32, i32
  }
  func.func @transform_4(%arg0: i32) -> (i32, i32) {
    %c0_i32 = arith.constant 0 : i32
    %c0_i32_0 = arith.constant 0 : i32
    %c0_i32_1 = arith.constant 0 : i32
    return %c0_i32, %c0_i32_0 : i32, i32
  }
  func.func @transform_5(%arg0: i32) -> (i32, i32) {
    %c0_i32 = arith.constant 0 : i32
    %c0_i32_0 = arith.constant 0 : i32
    %c0_i32_1 = arith.constant 0 : i32
    return %c0_i32, %c0_i32_0 : i32, i32
  }
  func.func @transform_6(%arg0: i32) -> i32 {
    %c0_i32 = arith.constant 0 : i32
    %c0_i32_0 = arith.constant 0 : i32
    return %c0_i32 : i32
  }
  func.func @transform_7(%arg0: i32) -> (i32, i32) {
    %c0_i32 = arith.constant 0 : i32
    %c0_i32_0 = arith.constant 0 : i32
    return %c0_i32, %arg0 : i32, i32
  }
}

</mosaic_0001>

<bundles_post_ra>
// kernel: tpu_custom_call.1
= control target key start
LH: loop header
LB: loop body
LE: loop exit
PB: predicated region body
PF: predicated region fallthrough
CT: control target
= control target key end

     0   :  { %v1361_v2 = vmov 0   ;;  %vm368_vm0 = vcmask 261120   ;;  %s1824_s0 = inlined_call_operand.vmem [shape: f32[8,32], index: 0, kind: input, shape index: {}]   ;;  %s1825_s1 = inlined_call_operand.vmem [shape: bf16[256,32], index: 1, kind: input, shape index: {}]   ;;  %s1826_s2 = inlined_call_operand.vmem [shape: f32[256,1], index: 2, kind: input, shape index: {}]   ;;  %s1827_s3 = inlined_call_operand.vmem [shape: bf16[128,256], index: 3, kind: input, shape index: {}]   ;;  %s1828_s4 = inlined_call_operand.vmem [shape: f32[128,1], index: 4, kind: input, shape index: {}]   ;;  %s1829_s5 = inlined_call_operand.vmem [shape: f32[128,1], index: 5, kind: input, shape index: {}]   ;;  %s1830_s6 = inlined_call_operand.<no memory space> [shape: f32[1], index: 6, kind: input, shape index: {}]   ;;  %s1831_s7 = inlined_call_operand.hbm [shape: f32[1,8], index: 7, kind: output, shape index: {}]  }
   0x1   :  { %v29_v0 = vld [vmem:[%s1824_s0] sm:$0xff]  ;;  %v113_v1 = vld [vmem:[%s1826_s2 + $0x88] sm:$0xff]  ;;  %1292 = vset.pattern.permute.xlu1 %v1361_v2  ;;  %v114_v5 = vld [vmem:[%s1826_s2 + $0x90] sm:$0xff] }
   0x2   :  { %30 = vxpose.xlu0.b32.start.end [1/1] (short) (narrow) %v29_v0, 32  ;;  %215 = vperm.xlu1 %1292, %v113_v1   ;;  %v96_v3 = vld [vmem:[%s1826_s2] sm:$0xff]  ;;  %v97_v4 = vld [vmem:[%s1826_s2 + $0x8] sm:$0xff]  ;;  %v115_v6 = vld [vmem:[%s1826_s2 + $0x98] sm:$0xff] }
   0x3   :  { %v1293_v7 = vld [vmem:[%s1825_s1] sm:$0xff]   ;;  %v98_v8 = vld [vmem:[%s1826_s2 + $0x10] sm:$0xff]  ;;  %v99_v9 = vld [vmem:[%s1826_s2 + $0x18] sm:$0xff] }
   0x4   :  { %1240 = vmatprep.mubr.msk.bf16.mxu0 %vm368_vm0, %v1293_v7 }
   0x6   :  { %130 = vperm.xlu1 %1292, %v96_v3  }
   0xa   :  { %135 = vperm.xlu1 %1292, %v97_v4  }
   0xe   :  { %220 = vperm.xlu1 %1292, %v114_v5  }
  0x12   :  { %225 = vperm.xlu1 %1292, %v115_v6  }
  0x16   :  { %140 = vperm.xlu1 %1292, %v98_v8  }
  0x1a   :  { %145 = vperm.xlu1 %1292, %v99_v9  }
  0x1b   :  { %13 = vsyncpa [#allocation4], 0  ;;  %v116_v10 = vld [vmem:[%s1826_s2 + $0xa0] sm:$0xff]  ;;  %v117_v11 = vld [vmem:[%s1826_s2 + $0xa8] sm:$0xff]  ;;  %vm1043_vm1 = vcmask 64512   ;;  %s1362_s15 = smov [#allocation3]  }
  0x1c   :  { %v100_v12 = vld [vmem:[%s1826_s2 + $0x20] sm:$0xff]  ;;  %v101_v13 = vld [vmem:[%s1826_s2 + $0x28] sm:$0xff]  ;;  %v118_v14 = vld [vmem:[%s1826_s2 + $0xb0] sm:$0xff]  ;;  %s1098_s16 = sshll.u32 %s1362_s15, 4  ;;  %vm1090_vm2 = vcmask 57344   ;;  %s1099_s16 = int_to_ptr.vmem [resolvable:$true] %s1098_s16 }
  0x1d   :  { %v119_v15 = vld [vmem:[%s1826_s2 + $0xb8] sm:$0xff]  ;;  %v102_v16 = vld [vmem:[%s1826_s2 + $0x30] sm:$0xff]  ;;  %v112_v17 = vld [vmem:[%s1826_s2 + $0x80] sm:$0xff]  ;;  %s1337_s17 = scalar_lea.vmem %s1099_s16, 16  ;;  %s1341_s18 = scalar_lea.vmem %s1099_s16, 32 }
  0x1e   :  { %230 = vperm.xlu1 %1292, %v116_v10   ;;  %v103_v18 = vld [vmem:[%s1826_s2 + $0x38] sm:$0xff]  ;;  %v120_v19 = vld [vmem:[%s1826_s2 + $0xc0] sm:$0xff]  ;;  %v121_v20 = vld [vmem:[%s1826_s2 + $0xc8] sm:$0xff]  ;;  %p1338_p0 = scmp.ne.s32.totalorder %s1099_s16, %s1337_s17  ;;  %p1342_p1 = scmp.lt.s32.totalorder %s1099_s16, %s1099_s16 }
  0x1f   :  { %v104_v21 = vld [vmem:[%s1826_s2 + $0x40] sm:$0xff]  ;;  %v105_v22 = vld [vmem:[%s1826_s2 + $0x48] sm:$0xff]  ;;  %v122_v23 = vld [vmem:[%s1826_s2 + $0xd0] sm:$0xff]  ;;  %p1343_p2 = scmp.lt.s32.totalorder %s1341_s18, %s1337_s17 }
  0x20   :  { %v123_v24 = vld [vmem:[%s1826_s2 + $0xd8] sm:$0xff]  ;;  %v106_v25 = vld [vmem:[%s1826_s2 + $0x50] sm:$0xff]  ;;  %v124_v27 = vld [vmem:[%s1826_s2 + $0xe0] sm:$0xff] }
  0x21   :  { %v107_v26 = vld [vmem:[%s1826_s2 + $0x58] sm:$0xff]  ;;  %v125_v28 = vld [vmem:[%s1826_s2 + $0xe8] sm:$0xff]  ;;  %v108_v29 = vld [vmem:[%s1826_s2 + $0x60] sm:$0xff]  ;;  %p1344_p3 = por %p1343_p2, %p1342_p1 }
  0x22   :  { %235 = vperm.xlu1 %1292, %v117_v11   ;;  %v109_v30 = vld [vmem:[%s1826_s2 + $0x68] sm:$0xff]  ;;  %v126_v31 = vld [vmem:[%s1826_s2 + $0xf0] sm:$0xff]  ;;  %v127_v32 = vld [vmem:[%s1826_s2 + $0xf8] sm:$0xff] }
  0x23   :  { %v110_v33 = vld [vmem:[%s1826_s2 + $0x70] sm:$0xff]  ;;  %v111_v34 = vld [vmem:[%s1826_s2 + $0x78] sm:$0xff]  ;;  %v642_v35 = vld [vmem:[%s1828_s4] sm:$0xff]  ;;  %p1345_p4 = pnand %p1344_p3, %p1338_p0 }
  0x24   :  { %v643_v36 = vld [vmem:[%s1828_s4 + $0x8] sm:$0xff]  ;;  %v644_v37 = vld [vmem:[%s1828_s4 + $0x10] sm:$0xff]  ;;  %v645_v38 = vld [vmem:[%s1828_s4 + $0x18] sm:$0xff] }
  0x25   :  { %v931_v39 = vld [vmem:[%s1829_s5] sm:$0xff]  ;;  %v932_v40 = vld [vmem:[%s1829_s5 + $0x8] sm:$0xff]  ;;  %v933_v42 = vld [vmem:[%s1829_s5 + $0x10] sm:$0xff] }
  0x26   :  { %150 = vperm.xlu1 %1292, %v100_v12   ;;  %v646_v41 = vld [vmem:[%s1828_s4 + $0x20] sm:$0xff]  ;;  %v647_v43 = vld [vmem:[%s1828_s4 + $0x28] sm:$0xff]  ;;  %v934_v44 = vld [vmem:[%s1829_s5 + $0x18] sm:$0xff] }
  0x27   :  { %v648_v45 = vld [vmem:[%s1828_s4 + $0x30] sm:$0xff]  ;;  %v935_v46 = vld [vmem:[%s1829_s5 + $0x20] sm:$0xff]  ;;  %v649_v47 = vld [vmem:[%s1828_s4 + $0x38] sm:$0xff] }
  0x28   :  { %v936_v48 = vld [vmem:[%s1829_s5 + $0x28] sm:$0xff]  ;;  %v650_v49 = vld [vmem:[%s1828_s4 + $0x40] sm:$0xff]  ;;  %v937_v50 = vld [vmem:[%s1829_s5 + $0x30] sm:$0xff] }
  0x29   :  { %v651_v51 = vld [vmem:[%s1828_s4 + $0x48] sm:$0xff]  ;;  %v938_v52 = vld [vmem:[%s1829_s5 + $0x38] sm:$0xff]  ;;  %v652_v53 = vld [vmem:[%s1828_s4 + $0x50] sm:$0xff] }
  0x2a   :  { %155 = vperm.xlu1 %1292, %v101_v13   ;;  %v939_v54 = vld [vmem:[%s1829_s5 + $0x40] sm:$0xff]  ;;  %v653_v55 = vld [vmem:[%s1828_s4 + $0x58] sm:$0xff]  ;;  %v940_v57 = vld [vmem:[%s1829_s5 + $0x48] sm:$0xff] }
  0x2b   :  { %1291 = vset.pattern.permute.xlu0 %v1361_v2  ;;  %v654_v58 = vld [vmem:[%s1828_s4 + $0x60] sm:$0xff]  ;;  %v941_v61 = vld [vmem:[%s1829_s5 + $0x50] sm:$0xff]  ;;  %v655_v62 = vld [vmem:[%s1828_s4 + $0x68] sm:$0xff] }
  0x2c   :  { %v942_v0 = vld [vmem:[%s1829_s5 + $0x58] sm:$0xff]  ;;  %v656_v1 = vld [vmem:[%s1828_s4 + $0x70] sm:$0xff]  ;;  %v943_v4 = vld [vmem:[%s1829_s5 + $0x60] sm:$0xff] }
  0x2d   :  { %v657_v5 = vld [vmem:[%s1828_s4 + $0x78] sm:$0xff]  ;;  %v1294_v6 = vld [vmem:[%s1825_s1 + $0x8] sm:$0xff]   ;;  %v1295_v7 = vld [vmem:[%s1825_s1 + $0x10] sm:$0xff]  }
  0x2e   :  { %240 = vperm.xlu1 %1292, %v118_v14   ;;  %v944_v8 = vld [vmem:[%s1829_s5 + $0x68] sm:$0xff]  ;;  %v945_v9 = vld [vmem:[%s1829_s5 + $0x70] sm:$0xff]  ;;  %v946_v10 = vld [vmem:[%s1829_s5 + $0x78] sm:$0xff] }
  0x2f   :  { %v1296_v11 = vld [vmem:[%s1825_s1 + $0x18] sm:$0xff]   ;;  %v1297_v12 = vld [vmem:[%s1825_s1 + $0x20] sm:$0xff]   ;;  %v1298_v13 = vld [vmem:[%s1825_s1 + $0x28] sm:$0xff]  }
  0x30   :  { %v1299_v14 = vld [vmem:[%s1825_s1 + $0x30] sm:$0xff]  }
  0x32   :  { %245 = vperm.xlu1 %1292, %v119_v15   ;;  %v1300_v15 = vld [vmem:[%s1825_s1 + $0x38] sm:$0xff]  }
  0x36   :  { %160 = vperm.xlu1 %1292, %v102_v16   ;;  %v1301_v16 = vld [vmem:[%s1825_s1 + $0x40] sm:$0xff]  }
  0x37   :  { %210 = vperm.xlu0 %1291, %v112_v17   ;;  %v1302_v17 = vld [vmem:[%s1825_s1 + $0x48] sm:$0xff]  }
  0x3a   :  { %165 = vperm.xlu1 %1292, %v103_v18   ;;  %v1303_v18 = vld [vmem:[%s1825_s1 + $0x50] sm:$0xff]  }
  0x3b   :  { %250 = vperm.xlu0 %1291, %v120_v19   ;;  %v1304_v19 = vld [vmem:[%s1825_s1 + $0x58] sm:$0xff]  }
  0x3e   :  { %255 = vperm.xlu1 %1292, %v121_v20   ;;  %v1305_v20 = vld [vmem:[%s1825_s1 + $0x60] sm:$0xff]  }
  0x3f   :  { %170 = vperm.xlu0 %1291, %v104_v21   ;;  %v1306_v21 = vld [vmem:[%s1825_s1 + $0x68] sm:$0xff]  }
  0x42   :  { %175 = vperm.xlu1 %1292, %v105_v22   ;;  %v1307_v22 = vld [vmem:[%s1825_s1 + $0x70] sm:$0xff]  }
  0x43   :  { %260 = vperm.xlu0 %1291, %v122_v23   ;;  %v1308_v23 = vld [vmem:[%s1825_s1 + $0x78] sm:$0xff]  }
  0x46   :  { %265 = vperm.xlu1 %1292, %v123_v24  }
  0x47   :  { %180 = vperm.xlu0 %1291, %v106_v25  }
  0x4a   :  { %185 = vperm.xlu1 %1292, %v107_v26  }
  0x4b   :  { %270 = vperm.xlu0 %1291, %v124_v27  }
  0x4e   :  { %275 = vperm.xlu1 %1292, %v125_v28  }
  0x4f   :  { %190 = vperm.xlu0 %1291, %v108_v29  }
  0x52   :  { %195 = vperm.xlu1 %1292, %v109_v30  }
  0x53   :  { %280 = vperm.xlu0 %1291, %v126_v31  }
  0x56   :  { %285 = vperm.xlu1 %1292, %v127_v32  }
  0x57   :  { %200 = vperm.xlu0 %1291, %v110_v33   ;;  %v1311_v33 = vld [vmem:[%s1827_s3 + $0x4] ss:$8 sps:$4 sm:$0xff]  }
  0x5a   :  { %205 = vperm.xlu1 %1292, %v111_v34   ;;  %v1314_v34 = vld [vmem:[%s1827_s3 + $0x14] ss:$8 sps:$4 sm:$0xff]  }
  0x5b   :  { %660 = vperm.xlu0 %1291, %v642_v35   ;;  %858 = vmatprep.mubr.bf16.mxu1 %v1314_v34 }
  0x5e   :  { %665 = vperm.xlu1 %1292, %v643_v36  }
  0x5f   :  { %670 = vperm.xlu0 %1291, %v644_v37  }
  0x62   :  { %675 = vperm.xlu1 %1292, %v645_v38  }
  0x63   :  { %949 = vperm.xlu0 %1291, %v931_v39  }
  0x66   :  { %954 = vperm.xlu1 %1292, %v932_v40  }
  0x67   :  { %680 = vperm.xlu0 %1291, %v646_v41  }
  0x6a   :  { %959 = vperm.xlu1 %1292, %v933_v42  }
  0x6b   :  { %685 = vperm.xlu0 %1291, %v647_v43  }
  0x6e   :  { %964 = vperm.xlu1 %1292, %v934_v44  }
  0x6f   :  { %690 = vperm.xlu0 %1291, %v648_v45  }
  0x72   :  { %969 = vperm.xlu1 %1292, %v935_v46  }
  0x73   :  { %695 = vperm.xlu0 %1291, %v649_v47  }
  0x76   :  { %974 = vperm.xlu1 %1292, %v936_v48  }
  0x77   :  { %700 = vperm.xlu0 %1291, %v650_v49  }
  0x7a   :  { %979 = vperm.xlu1 %1292, %v937_v50  }
  0x7b   :  { %705 = vperm.xlu0 %1291, %v651_v51  }
  0x7e   :  { %984 = vperm.xlu1 %1292, %v938_v52  }
  0x7f   :  { %710 = vperm.xlu0 %1291, %v652_v53  }
  0x81   :  { %v1662_v24 = vpop.permute.xlu1 %215 }
  0x82   :  { %v46_v56 = vpop.trf.xlu0  ;;  %989 = vperm.xlu1 %1292, %v939_v54  }
  0x83   :  { %715 = vperm.xlu0 %1291, %v653_v55  }
  0x85   :  { %v131_v25 = vpop.permute.xlu1 %130 }
  0x86   :  { %v47_v59 = vpop.trf.xlu0  ;;  %994 = vperm.xlu1 %1292, %v940_v57  }
  0x87   :  { %v62_v60 = vpack.c.bf16 %v47_v59, %v46_v56  ;;  %720 = vperm.xlu0 %1291, %v654_v58  }
  0x89   :  { %1236 = vmatprep.subr.bf16.mxu0 %v62_v60  ;;  %v136_v26 = vpop.permute.xlu1 %135 }
  0x8a   :  { %1237 = vmatpush3.bf16.msra.mxu0 %v62_v60  ;;  %v48_v63 = vpop.trf.xlu0  ;;  %999 = vperm.xlu1 %1292, %v941_v61  }
  0x8b   :  { %725 = vperm.xlu0 %1291, %v655_v62  }
  0x8d   :  { %v1664_v27 = vpop.permute.xlu1 %220 }
  0x8e   :  { %v49_v2 = vpop.trf.xlu0  ;;  %1004 = vperm.xlu1 %1292, %v942_v0  }
  0x8f   :  { %v63_v3 = vpack.c.bf16 %v49_v2, %v48_v63  ;;  %730 = vperm.xlu0 %1291, %v656_v1  }
  0x91   :  { %1238 = vmatprep.subr.bf16.mxu0 %v63_v3  ;;  %v1666_v28 = vpop.permute.xlu1 %225 }
  0x92   :  { %1239 = vmatpush3.bf16.msra.mxu0 %v63_v3  ;;  %1009 = vperm.xlu1 %1292, %v943_v4  }
  0x93   :  { %735 = vperm.xlu0 %1291, %v657_v5  }
  0x95   :  { %1241 = vmatmul.mubr.msk.bf16.vlgmr.msra.gmra.mrb[0].mxu0 %vm368_vm0, %v1294_v6  ;;  %v141_v29 = vpop.permute.xlu1 %140 }
  0x96   :  { %1244 = vmatprep.mubr.msk.bf16.mxu0 %vm368_vm0, %v1295_v7  ;;  %1014 = vperm.xlu1 %1292, %v944_v8  }
  0x97   :  { %1019 = vperm.xlu0 %1291, %v945_v9  }
  0x99   :  { %v146_v30 = vpop.permute.xlu1 %145 }
  0x9a   :  { %1024 = vperm.xlu1 %1292, %v946_v10  }
  0x9d   :  { %1245 = vmatmul.mubr.msk.bf16.gmra.mrb[4].mxu0 %vm368_vm0, %v1296_v11  ;;  %v1668_v31 = vpop.permute.xlu1 %230 }
  0x9e   :  { %1248 = vmatprep.mubr.msk.bf16.mxu0 %vm368_vm0, %v1297_v12 }
  0xa1   :  { %v1670_v32 = vpop.permute.xlu1 %235 }
  0xa5   :  { %1249 = vmatmul.mubr.msk.bf16.gmra.mrb[8].mxu0 %vm368_vm0, %v1298_v13  ;;  %v151_v35 = vpop.permute.xlu1 %150 }
  0xa6   :  { %1252 = vmatprep.mubr.msk.bf16.mxu0 %vm368_vm0, %v1299_v14 }
  0xa9   :  { %v156_v36 = vpop.permute.xlu1 %155 }
  0xad   :  { %1253 = vmatmul.mubr.msk.bf16.gmra.mrb[12].mxu0 %vm368_vm0, %v1300_v15  ;;  %v1678_v37 = vpop.permute.xlu1 %240 }
  0xae   :  { %1256 = vmatprep.mubr.msk.bf16.mxu0 %vm368_vm0, %v1301_v16 }
  0xb1   :  { %v1680_v38 = vpop.permute.xlu1 %245 }
  0xb5   :  { %1257 = vmatmul.mubr.msk.bf16.gmra.mrb[16].mxu0 %vm368_vm0, %v1302_v17  ;;  %v161_v39 = vpop.permute.xlu1 %160 }
  0xb6   :  { %1260 = vmatprep.mubr.msk.bf16.mxu0 %vm368_vm0, %v1303_v18  ;;  %v1682_v40 = vpop.permute.xlu0 %210 }
  0xb9   :  { %v166_v41 = vpop.permute.xlu1 %165 }
  0xba   :  { %v1684_v42 = vpop.permute.xlu0 %250 }
  0xbd   :  { %1261 = vmatmul.mubr.msk.bf16.gmra.mrb[20].mxu0 %vm368_vm0, %v1304_v19  ;;  %v1686_v43 = vpop.permute.xlu1 %255 }
  0xbe   :  { %1264 = vmatprep.mubr.msk.bf16.mxu0 %vm368_vm0, %v1305_v20  ;;  %v171_v44 = vpop.permute.xlu0 %170 }
  0xc1   :  { %v176_v45 = vpop.permute.xlu1 %175 }
  0xc2   :  { %v1688_v46 = vpop.permute.xlu0 %260 }
  0xc5   :  { %1265 = vmatmul.mubr.msk.bf16.gmra.mrb[24].mxu0 %vm368_vm0, %v1306_v21  ;;  %v1690_v47 = vpop.permute.xlu1 %265 }
  0xc6   :  { %1268 = vmatprep.mubr.msk.bf16.mxu0 %vm368_vm0, %v1307_v22  ;;  %v181_v48 = vpop.permute.xlu0 %180 }
  0xc9   :  { %v186_v52 = vpop.permute.xlu1 %185 }
  0xca   :  { %v1692_v60 = vpop.permute.xlu0 %270 }
  0xcd   :  { %1269 = vmatmul.mubr.msk.bf16.gmra.mrb[28].mxu0 %vm368_vm0, %v1308_v23  ;;  %v1696_v0 = vpop.permute.xlu1 %275 }
  0xce   :  { %850 = vmatprep.mubr.bf16.mxu0 %v1311_v33  ;;  %v191_v9 = vpop.permute.xlu0 %190 }
  0xd1   :  { %v196_v13 = vpop.permute.xlu1 %195 }
  0xd2   :  { %v1704_v21 = vpop.permute.xlu0 %280 }
 0x168   :  { %v1242_v49 = vpop.f32.mrb[0].mxu0 }
 0x169   :  { %v460_v50 = vadd.f32 %v1242_v49, %v141_v29  ;;  %v451_v51 = vpop.f32.mrb[1].mxu0  ;;  %v1706_v29 = vpop.permute.xlu1 %285 }
 0x16a   :  { %v452_v53 = vadd.f32 %v451_v51, %v131_v25  ;;  %v1243_v54 = vpop.f32.mrb[2].mxu0 }
 0x16b   :  { %v463_v55 = vadd.f32 %v1243_v54, %v146_v30  ;;  %v454_v56 = vpop.f32.mrb[3].mxu0  ;;  %v580_v58 = vmax.f32 %v460_v50, 0.0 }
 0x16c   :  { %v455_v57 = vadd.f32 %v454_v56, %v136_v26  ;;  %v578_v61 = vmax.f32 %v452_v53, 0.0 }
 0x16d   :  { %v581_v59 = vmax.f32 %v463_v55, 0.0  ;;  %v206_v53 = vpop.permute.xlu1 %205 }
 0x16e   :  { %v579_v62 = vmax.f32 %v455_v57, 0.0 }
 0x16f   :  { %v1694_v63 = vpack.c.bf16 %v581_v59, %v580_v58 }
 0x170   :  { %v1698_v1 = vpack.c.bf16 %v579_v62, %v578_v61  ;;  %v1246_v2 = vpop.f32.mrb[4].mxu0 }
 0x171   :  { %v476_v3 = vadd.f32 %v1246_v2, %v161_v39  ;;  %v467_v4 = vpop.f32.mrb[5].mxu0 }
 0x172   :  { %v468_v5 = vadd.f32 %v467_v4, %v151_v35  ;;  %v1247_v6 = vpop.f32.mrb[6].mxu0 }
 0x173   :  { %v479_v7 = vadd.f32 %v1247_v6, %v166_v41  ;;  %v470_v8 = vpop.f32.mrb[7].mxu0  ;;  %v584_v11 = vmax.f32 %v476_v3, 0.0  ;;  %v201_v41 = vpop.permute.xlu0 %200 }
 0x174   :  { %v471_v10 = vadd.f32 %v470_v8, %v156_v36  ;;  %v582_v14 = vmax.f32 %v468_v5, 0.0 }
 0x175   :  { %v585_v12 = vmax.f32 %v479_v7, 0.0 }
 0x176   :  { %v583_v15 = vmax.f32 %v471_v10, 0.0 }
 0x177   :  { %v1700_v16 = vpack.c.bf16 %v585_v12, %v584_v11 }
 0x178   :  { %v1702_v17 = vpack.c.bf16 %v583_v15, %v582_v14  ;;  %v1250_v18 = vpop.f32.mrb[8].mxu0 }
 0x179   :  { %v492_v19 = vadd.f32 %v1250_v18, %v181_v48  ;;  %v483_v20 = vpop.f32.mrb[9].mxu0 }
 0x17a   :  { %v484_v22 = vadd.f32 %v483_v20, %v171_v44  ;;  %v1251_v23 = vpop.f32.mrb[10].mxu0 }
 0x17b   :  { %v495_v25 = vadd.f32 %v1251_v23, %v186_v52  ;;  %v486_v26 = vpop.f32.mrb[11].mxu0  ;;  %v588_v33 = vmax.f32 %v492_v19, 0.0 }
 0x17c   :  { %v487_v30 = vadd.f32 %v486_v26, %v176_v45  ;;  %v586_v35 = vmax.f32 %v484_v22, 0.0 }
 0x17d   :  { %v589_v34 = vmax.f32 %v495_v25, 0.0 }
 0x17e   :  { %v587_v36 = vmax.f32 %v487_v30, 0.0 }
 0x17f   :  { %v1708_v39 = vpack.c.bf16 %v589_v34, %v588_v33 }
 0x180   :  { %v1710_v49 = vpack.c.bf16 %v587_v36, %v586_v35  ;;  %v1254_v48 = vpop.f32.mrb[12].mxu0 }
 0x181   :  { %v508_v50 = vadd.f32 %v1254_v48, %v201_v41  ;;  %v499_v51 = vpop.f32.mrb[13].mxu0 }
 0x182   :  { %v500_v44 = vadd.f32 %v499_v51, %v191_v9  ;;  %v1255_v54 = vpop.f32.mrb[14].mxu0 }
 0x183   :  { %v511_v52 = vadd.f32 %v1255_v54, %v206_v53  ;;  %v502_v55 = vpop.f32.mrb[15].mxu0  ;;  %v592_v57 = vmax.f32 %v508_v50, 0.0 }
 0x184   :  { %v503_v56 = vadd.f32 %v502_v55, %v196_v13  ;;  %v590_v58 = vmax.f32 %v500_v44, 0.0 }
 0x185   :  { %v593_v45 = vmax.f32 %v511_v52, 0.0 }
 0x186   :  { %v591_v59 = vmax.f32 %v503_v56, 0.0 }
 0x187   :  { %v1712_v61 = vpack.c.bf16 %v593_v45, %v592_v57 }
 0x188   :  { %v1714_v62 = vpack.c.bf16 %v591_v59, %v590_v58  ;;  %v1258_v2 = vpop.f32.mrb[16].mxu0  ;;  %v1318_v58 = vld [vmem:[%s1827_s3 + $0x34] ss:$8 sps:$4 sm:$0xff]   ;;  %v1320_v59 = vld [vmem:[%s1827_s3 + $0x30] ss:$8 sps:$4 sm:$0xff]  }
 0x189   :  { %v524_v3 = vadd.f32 %v1258_v2, %v1664_v27  ;;  %v515_v4 = vpop.f32.mrb[17].mxu0  ;;  %v1324_v2 = vld [vmem:[%s1827_s3 + $0x54] ss:$8 sps:$4 sm:$0xff]  }
 0x18a   :  { %v516_v5 = vadd.f32 %v515_v4, %v1682_v40  ;;  %v1259_v6 = vpop.f32.mrb[18].mxu0  ;;  %v1327_v4 = vld [vmem:[%s1827_s3 + $0x64] ss:$8 sps:$4 sm:$0xff]  }
 0x18b   :  { %v527_v7 = vadd.f32 %v1259_v6, %v1666_v28  ;;  %v518_v8 = vpop.f32.mrb[19].mxu0  ;;  %v596_v10 = vmax.f32 %v524_v3, 0.0  ;;  %v1326_v3 = vld [vmem:[%s1827_s3 + $0x50] ss:$8 sps:$4 sm:$0xff]   ;;  %v1330_v6 = vld [vmem:[%s1827_s3 + $0x74] ss:$8 sps:$4 sm:$0xff]  }
 0x18c   :  { %v519_v9 = vadd.f32 %v518_v8, %v1662_v24  ;;  %v594_v12 = vmax.f32 %v516_v5, 0.0  ;;  %v1329_v5 = vld [vmem:[%s1827_s3 + $0x60] ss:$8 sps:$4 sm:$0xff]   ;;  %v666_v8 = vpop.permute.xlu1 %665 }
 0x18d   :  { %v597_v11 = vmax.f32 %v527_v7, 0.0  ;;  %v1332_v7 = vld [vmem:[%s1827_s3 + $0x70] ss:$8 sps:$4 sm:$0xff]  }
 0x18e   :  { %v595_v13 = vmax.f32 %v519_v9, 0.0  ;;  %v661_v9 = vpop.permute.xlu0 %660 }
 0x18f   :  { %v635_v14 = vpack.c.bf16 %v597_v11, %v596_v10 }
 0x190   :  { %v634_v15 = vpack.c.bf16 %v595_v13, %v594_v12  ;;  %v1262_v18 = vpop.f32.mrb[20].mxu0  ;;  %v676_v10 = vpop.permute.xlu1 %675 }
 0x191   :  { %v540_v19 = vadd.f32 %v1262_v18, %v1678_v37  ;;  %v531_v20 = vpop.f32.mrb[21].mxu0 }
 0x192   :  { %v532_v27 = vadd.f32 %v531_v20, %v1668_v31  ;;  %v1263_v22 = vpop.f32.mrb[22].mxu0  ;;  %1172 = vmatprep.subr.bf16.mxu0 %v634_v15  ;;  %1272 = vmatprep.subr.bf16.mxu1 %v634_v15  ;;  %v671_v11 = vpop.permute.xlu0 %670 }
 0x193   :  { %v543_v28 = vadd.f32 %v1263_v22, %v1680_v38  ;;  %v534_v40 = vpop.f32.mrb[23].mxu0  ;;  %1173 = vmatpush3.bf16.msra.mxu0 %v1698_v1  ;;  %1280 = vmatpush3.bf16.msra.mxu1 %v1698_v1  ;;  %v600_v23 = vmax.f32 %v540_v19, 0.0 }
 0x194   :  { %v535_v24 = vadd.f32 %v534_v40, %v1670_v32  ;;  %1174 = vmatprep.subr.bf16.mxu0 %v635_v14  ;;  %1273 = vmatprep.subr.bf16.mxu1 %v635_v14  ;;  %v598_v37 = vmax.f32 %v532_v27, 0.0  ;;  %v955_v12 = vpop.permute.xlu1 %954 }
 0x195   :  { %v601_v25 = vmax.f32 %v543_v28, 0.0 }
 0x196   :  { %v599_v26 = vmax.f32 %v535_v24, 0.0  ;;  %v950_v13 = vpop.permute.xlu0 %949 }
 0x197   :  { %v637_v30 = vpack.c.bf16 %v601_v25, %v600_v23  ;;  %1175 = vmatpush3.bf16.msra.mxu0 %v1694_v63  ;;  %1281 = vmatpush3.bf16.msra.mxu1 %v1694_v63 }
 0x198   :  { %v636_v31 = vpack.c.bf16 %v599_v26, %v598_v37  ;;  %v1266_v38 = vpop.f32.mrb[24].mxu0  ;;  %v960_v14 = vpop.permute.xlu1 %959 }
 0x199   :  { %v556_v33 = vadd.f32 %v1266_v38, %v1688_v46  ;;  %v547_v34 = vpop.f32.mrb[25].mxu0 }
 0x19a   :  { %v548_v1 = vadd.f32 %v547_v34, %v1684_v42  ;;  %v1267_v35 = vpop.f32.mrb[26].mxu0  ;;  %1176 = vmatprep.subr.bf16.mxu0 %v636_v31  ;;  %1274 = vmatprep.subr.bf16.mxu1 %v636_v31  ;;  %v681_v15 = vpop.permute.xlu0 %680 }
 0x19b   :  { %v559_v32 = vadd.f32 %v1267_v35, %v1690_v47  ;;  %v550_v36 = vpop.f32.mrb[27].mxu0  ;;  %1177 = vmatpush3.bf16.msra.mxu0 %v1702_v17  ;;  %1282 = vmatpush3.bf16.msra.mxu1 %v1702_v17  ;;  %v604_v63 = vmax.f32 %v556_v33, 0.0 }
 0x19c   :  { %v551_v41 = vadd.f32 %v550_v36, %v1686_v43  ;;  %1178 = vmatprep.subr.bf16.mxu0 %v637_v30  ;;  %1275 = vmatprep.subr.bf16.mxu1 %v637_v30  ;;  %v602_v46 = vmax.f32 %v548_v1, 0.0  ;;  %v965_v18 = vpop.permute.xlu1 %964 }
 0x19d   :  { %v605_v48 = vmax.f32 %v559_v32, 0.0 }
 0x19e   :  { %v603_v50 = vmax.f32 %v551_v41, 0.0  ;;  %v686_v19 = vpop.permute.xlu0 %685 }
 0x19f   :  { %v639_v51 = vpack.c.bf16 %v605_v48, %v604_v63  ;;  %1179 = vmatpush3.bf16.msra.mxu0 %v1700_v16  ;;  %1283 = vmatpush3.bf16.msra.mxu1 %v1700_v16 }
 0x1a0   :  { %v638_v42 = vpack.c.bf16 %v603_v50, %v602_v46  ;;  %v1270_v47 = vpop.f32.mrb[28].mxu0  ;;  %v970_v20 = vpop.permute.xlu1 %969 }
 0x1a1   :  { %v572_v53 = vadd.f32 %v1270_v47, %v1704_v21  ;;  %v563_v44 = vpop.f32.mrb[29].mxu0 }
 0x1a2   :  { %v564_v17 = vadd.f32 %v563_v44, %v1692_v60  ;;  %v1271_v54 = vpop.f32.mrb[30].mxu0  ;;  %1180 = vmatprep.subr.bf16.mxu0 %v638_v42  ;;  %1276 = vmatprep.subr.bf16.mxu1 %v638_v42  ;;  %v691_v27 = vpop.permute.xlu0 %690 }
 0x1a3   :  { %v575_v43 = vadd.f32 %v1271_v54, %v1706_v29  ;;  %v566_v52 = vpop.f32.mrb[31].mxu0  ;;  %1181 = vmatpush3.bf16.msra.mxu0 %v1710_v49  ;;  %1284 = vmatpush3.bf16.msra.mxu1 %v1710_v49  ;;  %v608_v16 = vmax.f32 %v572_v53, 0.0  ;;  %v1312_v29 = vld [vmem:[%s1827_s3 + $0x10] ss:$8 sps:$4 sm:$0xff]   ;;  %v1317_v49 = vld [vmem:[%s1827_s3 + $0x20] ss:$8 sps:$4 sm:$0xff]  }
 0x1a4   :  { %v567_v55 = vadd.f32 %v566_v52, %v1696_v0  ;;  %1182 = vmatprep.subr.bf16.mxu0 %v639_v51  ;;  %1277 = vmatprep.subr.bf16.mxu1 %v639_v51  ;;  %v606_v21 = vmax.f32 %v564_v17, 0.0  ;;  %v1309_v0 = vld [vmem:[%s1827_s3] ss:$8 sps:$4 sm:$0xff]   ;;  %v975_v22 = vpop.permute.xlu1 %974 }
 0x1a5   :  { %v609_v56 = vmax.f32 %v575_v43, 0.0 }
 0x1a6   :  { %v607_v57 = vmax.f32 %v567_v55, 0.0  ;;  %v1790_v28 = vpop.permute.xlu0 %695 }
 0x1a7   :  { %v641_v45 = vpack.c.bf16 %v609_v56, %v608_v16  ;;  %1183 = vmatpush3.bf16.msra.mxu0 %v1708_v39  ;;  %1285 = vmatpush3.bf16.msra.mxu1 %v1708_v39  ;;  %v1315_v39 = vld [vmem:[%s1827_s3 + $0x24] ss:$8 sps:$4 sm:$0xff]  }
 0x1a8   :  { %v640_v60 = vpack.c.bf16 %v607_v57, %v606_v21  ;;  %v980_v50 = vpop.permute.xlu1 %979 }
 0x1aa   :  { %1184 = vmatprep.subr.bf16.mxu0 %v640_v60  ;;  %1278 = vmatprep.subr.bf16.mxu1 %v640_v60  ;;  %v701_v36 = vpop.permute.xlu0 %700 }
 0x1ab   :  { %1185 = vmatpush3.bf16.msra.mxu0 %v1714_v62  ;;  %1286 = vmatpush3.bf16.msra.mxu1 %v1714_v62  ;;  %v1323_v62 = vld [vmem:[%s1827_s3 + $0x40] ss:$8 sps:$4 sm:$0xff]  }
 0x1ac   :  { %1186 = vmatprep.subr.bf16.mxu0 %v641_v45  ;;  %1279 = vmatprep.subr.bf16.mxu1 %v641_v45  ;;  %v985_v60 = vpop.permute.xlu1 %984 }
 0x1ae   :  { %v706_v16 = vpop.permute.xlu0 %705 }
 0x1af   :  { %1187 = vmatpush3.bf16.msra.mxu0 %v1712_v61  ;;  %1287 = vmatpush3.bf16.msra.mxu1 %v1712_v61  ;;  %v1321_v61 = vld [vmem:[%s1827_s3 + $0x44] ss:$8 sps:$4 sm:$0xff]  }
 0x1b2   :  { %851 = vmatmul.mubr.bf16.vlgmr.msra.gmra.mrb[32].mxu0 %v1309_v0  ;;  %859 = vmatmul.mubr.bf16.vlgmr.msra.gmra.mrb[0].mxu1 %v1312_v29 }
 0x1b3   :  { %866 = vmatprep.mubr.bf16.mxu1 %v1315_v39 }
 0x1ba   :  { %867 = vmatmul.mubr.bf16.gmra.mrb[4].mxu1 %v1317_v49 }
 0x1bb   :  { %874 = vmatprep.mubr.bf16.mxu1 %v1318_v58 }
 0x1c2   :  { %875 = vmatmul.mubr.bf16.gmra.mrb[8].mxu1 %v1320_v59 }
 0x1c3   :  { %882 = vmatprep.mubr.bf16.mxu1 %v1321_v61 }
 0x1ca   :  { %883 = vmatmul.mubr.bf16.gmra.mrb[12].mxu1 %v1323_v62 }
 0x1cb   :  { %890 = vmatprep.mubr.bf16.mxu1 %v1324_v2 }
 0x1d2   :  { %891 = vmatmul.mubr.bf16.gmra.mrb[16].mxu1 %v1326_v3 }
 0x1d3   :  { %898 = vmatprep.mubr.bf16.mxu1 %v1327_v4 }
 0x1da   :  { %899 = vmatmul.mubr.bf16.gmra.mrb[20].mxu1 %v1329_v5 }
 0x1db   :  { %906 = vmatprep.mubr.bf16.mxu1 %v1330_v6  ;;  %v711_v6 = vpop.permute.xlu0 %710 }
 0x1e2   :  { %907 = vmatmul.mubr.bf16.gmra.mrb[24].mxu1 %v1332_v7 }
 0x285   :  { %v1188_v40 = vpop.f32.mrb[32].mxu0  ;;  %v1194_v24 = vpop.f32.mrb[0].mxu1 }
 0x286   :  { %v1189_v23 = vpop.f32.mrb[33].mxu0  ;;  %v1195_v25 = vpop.f32.mrb[1].mxu1 }
 0x287   :  { %v1190_v37 = vadd.f32 %v1189_v23, %v1188_v40  ;;  %v1196_v26 = vadd.f32 %v1195_v25, %v1194_v24  ;;  %v1191_v30 = vpop.f32.mrb[34].mxu0  ;;  %v1197_v31 = vpop.f32.mrb[2].mxu1 }
 0x288   :  { %v1192_v38 = vpop.f32.mrb[35].mxu0  ;;  %v1198_v33 = vpop.f32.mrb[3].mxu1 }
 0x289   :  { %v853_v34 = vadd.f32 %v1190_v37, %v661_v9  ;;  %v861_v1 = vadd.f32 %v1196_v26, %v671_v11  ;;  %v1193_v35 = vadd.f32 %v1192_v38, %v1191_v30  ;;  %v1199_v32 = vadd.f32 %v1198_v33, %v1197_v31  ;;  %v716_v23 = vpop.permute.xlu0 %715 }
 0x28b   :  { %v915_v41 = vmax.f32 %v853_v34, 0.0  ;;  %v917_v63 = vmax.f32 %v861_v1, 0.0  ;;  %v856_v48 = vadd.f32 %v1193_v35, %v666_v8  ;;  %v864_v46 = vadd.f32 %v1199_v32, %v676_v10  ;;  %v990_v10 = vpop.permute.xlu1 %989 }
 0x28d   :  { %v1027_v51 = vmul.f32 %v950_v13, %v915_v41  ;;  %v916_v42 = vmax.f32 %v856_v48, 0.0  ;;  %v918_v47 = vmax.f32 %v864_v46, 0.0  ;;  %v1200_v53 = vpop.f32.mrb[4].mxu1  ;;  %v1029_v17 = vmul.f32 %v960_v14, %v917_v63  ;;  %v721_v63 = vpop.permute.xlu0 %720 }
 0x28e   :  { %v1201_v44 = vpop.f32.mrb[5].mxu1 }
 0x28f   :  { %v1028_v54 = vmul.f32 %v955_v12, %v916_v42  ;;  %v1203_v43 = vpop.f32.mrb[6].mxu1  ;;  %v1202_v52 = vadd.f32 %v1201_v44, %v1200_v53  ;;  %v1044_v56 = vsel %vm1043_vm1, %v1027_v51, 0.0  ;;  %v1030_v57 = vmul.f32 %v965_v18, %v918_v47 }
 0x290   :  { %v1204_v55 = vpop.f32.mrb[7].mxu1  ;;  %v1047_v39 = vsel %vm1043_vm1, %v1029_v17, 0.0 }
 0x291   :  { %v1045_v21 = vsel %vm1043_vm1, %v1028_v54, 0.0  ;;  %v1205_v45 = vadd.f32 %v1204_v55, %v1203_v43  ;;  %v869_v29 = vadd.f32 %v1202_v52, %v681_v15  ;;  %v1049_v61 = vsel %vm1043_vm1, %v1030_v57, 0.0  ;;  %v726_v55 = vpop.permute.xlu0 %725 }
 0x292   :  { %v1046_v0 = vadd.f32 %v1045_v21, %v1044_v56 }
 0x293   :  { %v872_v49 = vadd.f32 %v1205_v45, %v686_v19  ;;  %v919_v59 = vmax.f32 %v869_v29, 0.0 }
 0x294   :  { %v1048_v58 = vadd.f32 %v1047_v39, %v1046_v0 }
 0x295   :  { %v920_v62 = vmax.f32 %v872_v49, 0.0  ;;  %v1206_v2 = vpop.f32.mrb[8].mxu1  ;;  %v1031_v4 = vmul.f32 %v970_v20, %v919_v59 }
 0x296   :  { %v1050_v3 = vadd.f32 %v1049_v61, %v1048_v58  ;;  %v1207_v5 = vpop.f32.mrb[9].mxu1  ;;  %v731_v58 = vpop.permute.xlu0 %730 }
 0x297   :  { %v1032_v7 = vmul.f32 %v975_v22, %v920_v62  ;;  %v1208_v8 = vadd.f32 %v1207_v5, %v1206_v2  ;;  %v1209_v9 = vpop.f32.mrb[10].mxu1  ;;  %v1051_v11 = vsel %vm1043_vm1, %v1031_v4, 0.0  ;;  %v995_v22 = vpop.permute.xlu1 %994 }
 0x298   :  { %v1210_v12 = vpop.f32.mrb[11].mxu1  ;;  %v1052_v13 = vadd.f32 %v1051_v11, %v1050_v3 }
 0x299   :  { %v1053_v14 = vsel %vm1043_vm1, %v1032_v7, 0.0  ;;  %v877_v15 = vadd.f32 %v1208_v8, %v691_v27  ;;  %v1211_v18 = vadd.f32 %v1210_v12, %v1209_v9 }
 0x29a   :  { %v1054_v19 = vadd.f32 %v1053_v14, %v1052_v13  ;;  %v736_v12 = vpop.permute.xlu0 %735 }
 0x29b   :  { %v921_v40 = vmax.f32 %v877_v15, 0.0  ;;  %v880_v24 = vadd.f32 %v1211_v18, %v1790_v28  ;;  %v1000_v46 = vpop.permute.xlu1 %999 }
 0x29d   :  { %v1033_v20 = vmul.f32 %v980_v50, %v921_v40  ;;  %v922_v25 = vmax.f32 %v880_v24, 0.0  ;;  %v1212_v37 = vpop.f32.mrb[12].mxu1 }
 0x29e   :  { %v1213_v26 = vpop.f32.mrb[13].mxu1 }
 0x29f   :  { %v1055_v30 = vsel %vm1043_vm1, %v1033_v20, 0.0  ;;  %v1034_v31 = vmul.f32 %v985_v60, %v922_v25  ;;  %v1214_v38 = vadd.f32 %v1213_v26, %v1212_v37  ;;  %v1215_v33 = vpop.f32.mrb[14].mxu1  ;;  %v1005_v57 = vpop.permute.xlu1 %1004 }
 0x2a0   :  { %v1056_v34 = vadd.f32 %v1055_v30, %v1054_v19  ;;  %v1216_v1 = vpop.f32.mrb[15].mxu1 }
 0x2a1   :  { %v1057_v27 = vsel %vm1043_vm1, %v1034_v31, 0.0  ;;  %v885_v35 = vadd.f32 %v1214_v38, %v701_v36  ;;  %v1217_v32 = vadd.f32 %v1216_v1, %v1215_v33 }
 0x2a2   :  { %v1058_v41 = vadd.f32 %v1057_v27, %v1056_v34  ;;  %v1020_v34 = vpop.permute.xlu0 %1019 }
 0x2a3   :  { %v923_v28 = vmax.f32 %v885_v35, 0.0  ;;  %v888_v48 = vadd.f32 %v1217_v32, %v706_v16  ;;  %v1010_v3 = vpop.permute.xlu1 %1009 }
 0x2a5   :  { %v1035_v50 = vmul.f32 %v990_v10, %v923_v28  ;;  %v924_v51 = vmax.f32 %v888_v48, 0.0  ;;  %v1218_v42 = vpop.f32.mrb[16].mxu1 }
 0x2a6   :  { %v1219_v47 = vpop.f32.mrb[17].mxu1 }
 0x2a7   :  { %v1059_v53 = vsel %vm1043_vm1, %v1035_v50, 0.0  ;;  %v1036_v44 = vmul.f32 %v995_v22, %v924_v51  ;;  %v1220_v17 = vadd.f32 %v1219_v47, %v1218_v42  ;;  %v1221_v54 = vpop.f32.mrb[18].mxu1  ;;  %v1015_v18 = vpop.permute.xlu1 %1014 }
 0x2a8   :  { %v1060_v43 = vadd.f32 %v1059_v53, %v1058_v41  ;;  %v1222_v52 = vpop.f32.mrb[19].mxu1  ;;  %v1082_v53 = vstv %s1830_s6 }
 0x2a9   :  { %v1061_v36 = vsel %vm1043_vm1, %v1036_v44, 0.0  ;;  %v893_v56 = vadd.f32 %v1220_v17, %v711_v6  ;;  %v1223_v21 = vadd.f32 %v1222_v52, %v1221_v54 }
 0x2aa   :  { %v1062_v45 = vadd.f32 %v1061_v36, %v1060_v43 }
 0x2ab   :  { %v925_v16 = vmax.f32 %v893_v56, 0.0  ;;  %v896_v60 = vadd.f32 %v1223_v21, %v716_v23  ;;  %v1025_v35 = vpop.permute.xlu1 %1024 }
 0x2ad   :  { %v1037_v0 = vmul.f32 %v1000_v46, %v925_v16  ;;  %v926_v29 = vmax.f32 %v896_v60, 0.0  ;;  %v1224_v39 = vpop.f32.mrb[20].mxu1 }
 0x2ae   :  { %v1225_v49 = vpop.f32.mrb[21].mxu1 }
 0x2af   :  { %v1063_v59 = vsel %vm1043_vm1, %v1037_v0, 0.0  ;;  %v1038_v61 = vmul.f32 %v1005_v57, %v926_v29  ;;  %v1226_v62 = vadd.f32 %v1225_v49, %v1224_v39  ;;  %v1227_v2 = vpop.f32.mrb[22].mxu1 }
 0x2b0   :  { %v1064_v4 = vadd.f32 %v1063_v59, %v1062_v45  ;;  %v1228_v5 = vpop.f32.mrb[23].mxu1 }
 0x2b1   :  { %v1065_v6 = vsel %vm1043_vm1, %v1038_v61, 0.0  ;;  %v901_v7 = vadd.f32 %v1226_v62, %v721_v63  ;;  %v1229_v8 = vadd.f32 %v1228_v5, %v1227_v2 }
 0x2b2   :  { %v1066_v9 = vadd.f32 %v1065_v6, %v1064_v4 }
 0x2b3   :  { %v927_v10 = vmax.f32 %v901_v7, 0.0  ;;  %v904_v11 = vadd.f32 %v1229_v8, %v726_v55 }
 0x2b5   :  { %v1039_v13 = vmul.f32 %v1010_v3, %v927_v10  ;;  %v928_v14 = vmax.f32 %v904_v11, 0.0  ;;  %v1230_v15 = vpop.f32.mrb[24].mxu1 }
 0x2b6   :  { %v1231_v19 = vpop.f32.mrb[25].mxu1 }
 0x2b7   :  { %v1067_v40 = vsel %vm1043_vm1, %v1039_v13, 0.0  ;;  %v1040_v24 = vmul.f32 %v1015_v18, %v928_v14  ;;  %v1232_v23 = vadd.f32 %v1231_v19, %v1230_v15  ;;  %v1233_v20 = vpop.f32.mrb[26].mxu1 }
 0x2b8   :  { %v1068_v25 = vadd.f32 %v1067_v40, %v1066_v9  ;;  %v1234_v37 = vpop.f32.mrb[27].mxu1 }
 0x2b9   :  { %v1069_v22 = vsel %vm1043_vm1, %v1040_v24, 0.0  ;;  %v909_v26 = vadd.f32 %v1232_v23, %v731_v58  ;;  %v1235_v30 = vadd.f32 %v1234_v37, %v1233_v20 }
 0x2ba   :  { %v1070_v31 = vadd.f32 %v1069_v22, %v1068_v25 }
 0x2bb   :  { %v929_v38 = vmax.f32 %v909_v26, 0.0  ;;  %v912_v33 = vadd.f32 %v1235_v30, %v736_v12 }
 0x2bd   :  { %v1041_v1 = vmul.f32 %v1020_v34, %v929_v38  ;;  %v930_v27 = vmax.f32 %v912_v33, 0.0 }
 0x2bf   :  { %v1071_v32 = vsel %vm1043_vm1, %v1041_v1, 0.0  ;;  %v1042_v41 = vmul.f32 %v1025_v35, %v930_v27 }
 0x2c0   :  { %v1072_v63 = vadd.f32 %v1071_v32, %v1070_v31 }
 0x2c1   :  { %v1073_v28 = vsel %vm1043_vm1, %v1042_v41, 0.0 }
 0x2c2   :  { %v1074_v48 = vadd.f32 %v1073_v28, %v1072_v63 }
 0x2c4   :  { %v1075_v46 = vrot.slane %v1074_v48, 4 }
 0x2c6   :  { %v1076_v50 = vadd.f32 %v1075_v46, %v1074_v48 }
 0x2c8   :  { %v1077_v51 = vrot.slane %v1076_v50, 2 }
 0x2ca   :  { %v1078_v42 = vadd.f32 %v1077_v51, %v1076_v50 }
 0x2cc   :  { %v1079_v47 = vrot.slane %v1078_v42, 1 }
 0x2ce   :  { %v1080_v44 = vadd.f32 %v1079_v47, %v1078_v42 }
 0x2d0   :  { %v1083_v17 = vadd.f32 %v1082_v53, %v1080_v44 }
 0x2d2   :  { %v1084_v54 = vsub.f32 0.0, %v1083_v17 }
 0x2d4   :  { %v1085_v43 = vmul.f32 1.442695, %v1084_v54 }
 0x2d6   :  { %1333 = vpow2.f32 %v1085_v43 }
 0x2e0   :  { %v1334_v52 = vpop.eup %1333 }
 0x2e1   :  { %v1087_v55 = vadd.f32 1.0, %v1334_v52 }
 0x2e3   :  { %1335 = vrcp.f32 %v1087_v55 }
 0x2ed   :  { %v1336_v36 = vpop.eup %1335 }
 0x2ee   :  { %1091 = vst.msk [vmem:[#allocation3] sm:$0x1] %vm1090_vm2, %v1336_v36 }
 0x2ef   :  { %1348 = shalt.err (!%p1345_p4)
}
 0x2f0   :  { %s1349_s5 = scalar_lea.hbm %s1831_s7, 16 }
 0x2f1   :  { %p1350_p5 = scmp.ne.s32.totalorder %s1831_s7, %s1349_s5  ;;  %p1353_p6 = scmp.lt.u32.totalorder %s1349_s5, %s1831_s7 }
 0x2f3   :  { %p1355_p7 = pnand %p1353_p6, %p1350_p5 }
 0x2f5   :  { %1358 = shalt.err (!%p1355_p7)
}
 0x2f6   :  { %1101 = dma.vmem_to_hbm [thread:$0]  %s1099_s16, 16, %s1831_s7, [#allocation4]  }
 0x2f7   :  { %1359 = dma.done.wait [#allocation4], 16  }
 0x2f8   :  { %1360 = vsyncadd [#allocation4], 4294967280 }
 0x2f9   :  { %1105 = vsyncpa [#allocation4], 1 }

</bundles_post_ra>
